<compile_context>
chip_gen: v7x
topology: tpu7x:2x2x1
jax: 0.10.0
libtpu: 0.0.40
codegen_flags: <defaults>
</compile_context>

<pallas_src>
import functools

import jax
import jax.numpy as jnp
from jax import lax
from jax.experimental import pallas as pl
from jax.experimental.pallas import tpu as pltpu

EPS = 1e-5                      # PyTorch BatchNorm2d default eps
LANE = 128                      # TPU lane width -> channel padding target
VMEM_LIMIT = 32 * 1024 * 1024   # conservative, fits every generation


def conv_stats_kernel(p_ref, w_ref, b_ref, y_ref, stats_ref):
    """Pass 1: one im2col matmul (bf16 in, f32 acc) + bias, plus per-channel
    sum / sum-of-squares accumulated across the row grid."""
    i = pl.program_id(0)

    acc = jnp.dot(p_ref[...], w_ref[...],
                  preferred_element_type=jnp.float32)            # (TM, Cp) f32
    acc = acc + b_ref[...]                                       # bias (1, Cp)
    y_ref[...] = acc

    part_sum = jnp.sum(acc, axis=0, keepdims=True)               # (1, Cp)
    part_sq = jnp.sum(acc * acc, axis=0, keepdims=True)          # (1, Cp)
    part = jnp.concatenate([part_sum, part_sq], axis=0)          # (2, Cp)

    @pl.when(i == 0)
    def _init():
        stats_ref[...] = jnp.zeros_like(stats_ref)

    stats_ref[...] = stats_ref[...] + part


def bn_relu_kernel(stats_ref, g_ref, beta_ref, y_ref, o_ref, *, inv_count):
    """Pass 2: BatchNorm (training-mode batch stats, biased var) + ReLU."""
    mean = stats_ref[0:1, :] * inv_count                         # (1, Cp)
    var = stats_ref[1:2, :] * inv_count - mean * mean            # E[x^2]-mean^2
    inv = lax.rsqrt(var + EPS)                                   # EUP slot
    scale = inv * g_ref[...]
    shift = beta_ref[...] - mean * scale
    o_ref[...] = jnp.maximum(y_ref[...] * scale + shift, 0.0)


def conv_block(x_nchw, w_oihw, bias, gamma, beta):
    """NCHW in / NCHW out, matching the PyTorch module's forward."""
    N, Cin, H, W = x_nchw.shape
    Cout, _, KH, KW = w_oihw.shape
    assert (KH, KW) == (3, 3)
    M = N * H * W
    Kdim = KH * KW * Cin
    Cp = ((Cout + LANE - 1) // LANE) * LANE                      # lane-dense Cout

    # TODO(synk): accept NHWC at the API boundary (or fuse transpose/pad into
    # the producer) to avoid these extra HBM round trips before the kernel.
    x_nhwc = jnp.transpose(x_nchw, (0, 2, 3, 1)).astype(jnp.float32)
    xp = jnp.pad(x_nhwc, ((0, 0), (1, 1), (1, 1), (0, 0)))       # padding=1

    # im2col once, wrapper side: (N,H,W,9,Cin) -> (M, 9*Cin), cast to bf16.
    taps = [xp[:, kh:kh + H, kw:kw + W, :]
            for kh in range(KH) for kw in range(KW)]
    patches = jnp.stack(taps, axis=3).reshape(M, Kdim).astype(jnp.bfloat16)

    # OIHW -> (KH,KW,Cin,Cout) -> (9*Cin, Cout), pad channels to Cp, bf16.
    w2d = jnp.transpose(w_oihw, (2, 3, 1, 0)).reshape(Kdim, Cout)
    w2d = jnp.pad(w2d, ((0, 0), (0, Cp - Cout))).astype(jnp.bfloat16)

    # Padded channels: bias=0, gamma=1, beta=0 -> output 0, no NaNs; sliced off.
    bias_p = jnp.pad(bias.astype(jnp.float32), (0, Cp - Cout)).reshape(1, Cp)
    gamma_p = jnp.pad(gamma.astype(jnp.float32), (0, Cp - Cout),
                      constant_values=1.0).reshape(1, Cp)
    beta_p = jnp.pad(beta.astype(jnp.float32), (0, Cp - Cout)).reshape(1, Cp)

    # Row tiling over the flattened (N*H*W) axis.
    TM = 128 if M % 128 == 0 else M
    assert M % TM == 0 and TM % 8 == 0, "row count must tile cleanly"
    grid = (M // TM,)

    # ---- pass 1: conv matmul + bias + per-channel sum / sumsq --------------
    y2d, stats = pl.pallas_call(
        conv_stats_kernel,
        grid=grid,
        in_specs=[
            pl.BlockSpec((TM, Kdim), lambda i: (i, 0)),   # patches (row tile)
            pl.BlockSpec((Kdim, Cp), lambda i: (0, 0)),   # weights (resident)
            pl.BlockSpec((1, Cp), lambda i: (0, 0)),      # bias   (resident)
        ],
        out_specs=[
            pl.BlockSpec((TM, Cp), lambda i: (i, 0)),     # conv output
            pl.BlockSpec((2, Cp), lambda i: (0, 0)),      # [sum; sumsq] accum
        ],
        out_shape=[
            jax.ShapeDtypeStruct((M, Cp), jnp.float32),
            jax.ShapeDtypeStruct((2, Cp), jnp.float32),
        ],
        compiler_params=pltpu.CompilerParams(
            dimension_semantics=("arbitrary",),           # stats accumulator
            vmem_limit_bytes=VMEM_LIMIT),
    )(patches, w2d, bias_p)

    # ---- pass 2: BN normalize + affine + ReLU (lane-dense stores) ----------
    out2d = pl.pallas_call(
        functools.partial(bn_relu_kernel, inv_count=1.0 / float(M)),
        grid=grid,
        in_specs=[
            pl.BlockSpec((2, Cp), lambda i: (0, 0)),      # stats   (resident)
            pl.BlockSpec((1, Cp), lambda i: (0, 0)),      # gamma   (resident)
            pl.BlockSpec((1, Cp), lambda i: (0, 0)),      # beta    (resident)
            pl.BlockSpec((TM, Cp), lambda i: (i, 0)),     # conv output tile
        ],
        out_specs=pl.BlockSpec((TM, Cp), lambda i: (i, 0)),
        out_shape=jax.ShapeDtypeStruct((M, Cp), jnp.float32),
        compiler_params=pltpu.CompilerParams(
            dimension_semantics=("parallel",),
            vmem_limit_bytes=VMEM_LIMIT),
    )(stats, gamma_p, beta_p, y2d)

    out = out2d.reshape(N, H, W, Cp)[..., :Cout]          # drop padded channels
    return jnp.transpose(out, (0, 3, 1, 2))               # back to NCHW


def reference(x_nchw, w_oihw, bias, gamma, beta):
    """Pure-JAX reference of the PyTorch forward (training-mode BN).

    Conv operands are bf16-rounded like the kernel path so the comparison
    isolates kernel correctness from bf16 input quantization."""
    xb = x_nchw.astype(jnp.bfloat16).astype(jnp.float32)
    wb = w_oihw.astype(jnp.bfloat16).astype(jnp.float32)
    y = lax.conv_general_dilated(
        xb, wb, window_strides=(1, 1), padding=((1, 1), (1, 1)),
        dimension_numbers=("NCHW", "OIHW", "NCHW"),
        preferred_element_type=jnp.float32)
    y = y + bias[None, :, None, None]
    mean = jnp.mean(y, axis=(0, 2, 3), keepdims=True)
    var = jnp.mean((y - mean) ** 2, axis=(0, 2, 3), keepdims=True)
    y = (y - mean) * lax.rsqrt(var + EPS)
    y = y * gamma[None, :, None, None] + beta[None, :, None, None]
    return jnp.maximum(y, 0.0)


if __name__ == "__main__":
    # Small shapes consistent with the module: batch=2, in_channels=4,
    # out_channels=8, spatial=16x16.
    N, Cin, Cout, H, W = 2, 4, 8, 16, 16
    K = 3

    key = jax.random.PRNGKey(0)
    kx, kw, kb, kg, kbeta = jax.random.split(key, 5)

    x = jax.random.normal(kx, (N, Cin, H, W), jnp.float32)
    fan_in = Cin * K * K
    w_conv = jax.random.normal(kw, (Cout, Cin, K, K), jnp.float32) / jnp.sqrt(fan_in)
    b_conv = 0.1 * jax.random.normal(kb, (Cout,), jnp.float32)
    gamma = 1.0 + 0.1 * jax.random.normal(kg, (Cout,), jnp.float32)
    beta = 0.1 * jax.random.normal(kbeta, (Cout,), jnp.float32)

    out = jax.block_until_ready(conv_block(x, w_conv, b_conv, gamma, beta))
    ref = jax.block_until_ready(reference(x, w_conv, b_conv, gamma, beta))

    assert out.shape == (N, Cout, H, W)
    max_err = float(jnp.max(jnp.abs(out - ref)))
    assert jnp.allclose(out, ref, atol=1e-3, rtol=1e-3), f"max abs err = {max_err}"

    print("KERNEL_OK")
</pallas_src>

<mosaic_0001>
module attributes {stable_mosaic.version = 11 : i64} {
  func.func @conv_stats_kernel(%arg0: i32, %arg1: memref<128x36xbf16, #tpu.memory_space<vmem>>, %arg2: memref<36x128xbf16, #tpu.memory_space<vmem>>, %arg3: memref<1x128xf32, #tpu.memory_space<vmem>>, %arg4: memref<128x128xf32, #tpu.memory_space<vmem>>, %arg5: memref<2x128xf32, #tpu.memory_space<vmem>>) attributes {dimension_semantics = [#tpu.dimension_semantics<arbitrary>], iteration_bounds = array<i64: 4>, scalar_prefetch = 0 : i64, scratch_operands = 0 : i64, tpu.core_type = #tpu.core_type<tc>, window_params = [{transform_indices = @transform_0, window_bounds = array<i64: 128, 36>}, {pipeline_mode = #tpu.pipeline_mode<synchronous>, transform_indices = @transform_1, window_bounds = array<i64: 36, 128>}, {pipeline_mode = #tpu.pipeline_mode<synchronous>, transform_indices = @transform_2, window_bounds = array<i64: 1, 128>}, {transform_indices = @transform_3, window_bounds = array<i64: 128, 128>}, {pipeline_mode = #tpu.pipeline_mode<synchronous>, transform_indices = @transform_4, window_bounds = array<i64: 2, 128>}]} {
    %c0 = arith.constant 0 : index
    %c0_0 = arith.constant 0 : index
    %0 = vector.load %arg1[%c0, %c0_0] : memref<128x36xbf16, #tpu.memory_space<vmem>>, vector<128x36xbf16>
    %c0_1 = arith.constant 0 : index
    %c0_2 = arith.constant 0 : index
    %1 = vector.load %arg2[%c0_1, %c0_2] : memref<36x128xbf16, #tpu.memory_space<vmem>>, vector<36x128xbf16>
    %cst = arith.constant dense<0.000000e+00> : vector<128x128xf32>
    %2 = tpu.matmul %0, %1, %cst {dimension_numbers = #tpu.dot_dimension_numbers<[1], [0], [0], [1], [0, 0, 1, 1], [], []>} : vector<128x36xbf16>, vector<36x128xbf16>, vector<128x128xf32> -> vector<128x128xf32>
    %c0_3 = arith.constant 0 : index
    %c0_4 = arith.constant 0 : index
    %3 = vector.load %arg3[%c0_3, %c0_4] : memref<1x128xf32, #tpu.memory_space<vmem>>, vector<1x128xf32>
    %4 = vector.broadcast %3 : vector<1x128xf32> to vector<128x128xf32>
    %5 = arith.addf %2, %4 : vector<128x128xf32>
    %c0_5 = arith.constant 0 : index
    %c0_6 = arith.constant 0 : index
    %6 = vector.load %arg4[%c0_5, %c0_6] : memref<128x128xf32, #tpu.memory_space<vmem>>, vector<128x128xf32>
    tpu.vector_store %arg4[%c0_5, %c0_6], %5 {strides = array<i32>} : memref<128x128xf32, #tpu.memory_space<vmem>>, vector<128x128xf32>,
    %cst_7 = arith.constant dense<0.000000e+00> : vector<128xf32>
    %7 = vector.multi_reduction <add>, %5, %cst_7 [0] : vector<128x128xf32> to vector<128xf32>
    %8 = vector.shape_cast %7 : vector<128xf32> to vector<1x128xf32>
    %9 = arith.mulf %5, %5 : vector<128x128xf32>
    %cst_8 = arith.constant dense<0.000000e+00> : vector<128xf32>
    %10 = vector.multi_reduction <add>, %9, %cst_8 [0] : vector<128x128xf32> to vector<128xf32>
    %11 = vector.shape_cast %10 : vector<128xf32> to vector<1x128xf32>
    %12 = tpu.concatenate %8, %11 in 0 : vector<1x128xf32>, vector<1x128xf32> -> vector<2x128xf32>
    %c0_i32 = arith.constant 0 : i32
    %13 = arith.cmpi eq, %arg0, %c0_i32 : i32
    %14 = arith.extui %13 : i1 to i32
    %c0_i32_9 = arith.constant 0 : i32
    %15 = arith.cmpi ne, %14, %c0_i32_9 : i32
    scf.if %15 {
      %cst_14 = arith.constant 0.000000e+00 : f32
      %19 = vector.broadcast %cst_14 : f32 to vector<2x128xf32>
      %c0_15 = arith.constant 0 : index
      %c0_16 = arith.constant 0 : index
      %20 = vector.load %arg5[%c0_15, %c0_16] : memref<2x128xf32, #tpu.memory_space<vmem>>, vector<2x128xf32>
      tpu.vector_store %arg5[%c0_15, %c0_16], %19 {strides = array<i32>} : memref<2x128xf32, #tpu.memory_space<vmem>>, vector<2x128xf32>,
    } else {
    }
    %c0_10 = arith.constant 0 : index
    %c0_11 = arith.constant 0 : index
    %16 = vector.load %arg5[%c0_10, %c0_11] : memref<2x128xf32, #tpu.memory_space<vmem>>, vector<2x128xf32>
    %17 = arith.addf %16, %12 : vector<2x128xf32>
    %c0_12 = arith.constant 0 : index
    %c0_13 = arith.constant 0 : index
    %18 = vector.load %arg5[%c0_12, %c0_13] : memref<2x128xf32, #tpu.memory_space<vmem>>, vector<2x128xf32>
    tpu.vector_store %arg5[%c0_12, %c0_13], %17 {strides = array<i32>} : memref<2x128xf32, #tpu.memory_space<vmem>>, vector<2x128xf32>,
    return
  }
  func.func @transform_0(%arg0: i32) -> (i32, i32) {
    %c0_i32 = arith.constant 0 : i32
    %c0_i32_0 = arith.constant 0 : i32
    return %arg0, %c0_i32 : i32, i32
  }
  func.func @transform_1(%arg0: i32) -> (i32, i32) {
    %c0_i32 = arith.constant 0 : i32
    %c0_i32_0 = arith.constant 0 : i32
    %c0_i32_1 = arith.constant 0 : i32
    return %c0_i32, %c0_i32_0 : i32, i32
  }
  func.func @transform_2(%arg0: i32) -> (i32, i32) {
    %c0_i32 = arith.constant 0 : i32
    %c0_i32_0 = arith.constant 0 : i32
    %c0_i32_1 = arith.constant 0 : i32
    return %c0_i32, %c0_i32_0 : i32, i32
  }
  func.func @transform_3(%arg0: i32) -> (i32, i32) {
    %c0_i32 = arith.constant 0 : i32
    %c0_i32_0 = arith.constant 0 : i32
    return %arg0, %c0_i32 : i32, i32
  }
  func.func @transform_4(%arg0: i32) -> (i32, i32) {
    %c0_i32 = arith.constant 0 : i32
    %c0_i32_0 = arith.constant 0 : i32
    %c0_i32_1 = arith.constant 0 : i32
    return %c0_i32, %c0_i32_0 : i32, i32
  }
}

</mosaic_0001>

<bundles_post_ra>
// kernel: tpu_custom_call.1
= control target key start
LH: loop header
LB: loop body
LE: loop exit
PB: predicated region body
PF: predicated region fallthrough
CT: control target
= control target key end

     0   :  { %10 = vsyncpa [#allocation3], 0  ;;  %s1033_s0 = inlined_call_operand.vmem [shape: bf16[512,36], index: 0, kind: input, shape index: {}]   ;;  %s1034_s1 = inlined_call_operand.vmem [shape: bf16[36,128], index: 1, kind: input, shape index: {}]   ;;  %s1035_s2 = inlined_call_operand.vmem [shape: f32[1,128], index: 2, kind: input, shape index: {}]   ;;  %s1036_s3 = inlined_call_operand.hbm [shape: f32[512,128], index: 3, kind: output, shape index: {0}]   ;;  %s1037_s4 = inlined_call_operand.hbm [shape: f32[2,128], index: 4, kind: output, shape index: {1}]  }
   0x1   :  { %12 = vsyncpa [#allocation3 + $0x1], 0 }
   0x2   :  { %13 = vsyncpa [#allocation5], 0  ;;  %s851_s15 = smov 0   ;;  %s853_s16 = smov 0  }
   0x3   :  { %s855_s17 = smov 0   ;;  %s857_s18 = smov 0  }
   0x4 LB: > { %s872_s19 = sadd.s32 4294967295, %s819_s18   ;;  %s590_s20 = sadd.s32 4294967294, %s819_s18   ;;  %s819_s18 = sphi %s857_s18, %s1043_s18   ;;  %s815_s17 = sphi %s855_s17, %s1042_s17   ;;  %s811_s16 = sphi %s853_s16, %s1041_s16   ;;  %s807_s15 = sphi %s851_s15, %s1040_s15  }
   0x5   : > { %s876_s21 = sadd.s32 1, %s819_s18   ;;  %s94_s22 = sadd.s32 1, %s815_s17 }
   0x6   : > { %s91_s23 = ssub.s32 %s819_s18, %s876_s21  ;;  %p104_p0 = scmp.ne.s32.totalorder %s815_s17, %s811_s16 }
   0x7   : > { %p92_p1 = scmp.eq.s32.totalorder %s91_s23, 0  ;;  %p105_p2 = scmp.eq.s32.totalorder %s872_s19, 3 }
   0x8   : > { %p110_p3 = scmp.ne.s32.totalorder %s811_s16, %s807_s15  ;;  %p111_p4 = scmp.eq.s32.totalorder %s590_s20, 3 }
   0x9   : > { %s887_s24 = scalar_select %p92_p1, %s815_s17, %s94_s22  }
   0xa   : > { %p891_p5 = por %p105_p2, %p104_p0  ;;  %p895_p6 = por %p111_p4, %p110_p3 }
   0xb   : > { %p593_p7 = scmp.ge.s32.totalorder %s819_s18, 1  ;;  %p165_p8 = scmp.lt.s32.totalorder %s819_s18, 5 }
   0xd   : > { %p166_p9 = pnand %p593_p7, %p165_p8 }
   0xe   : > { %v716_v0 = vld [vmem:[%s1034_s1] sm:$0xff] (!%p166_p9)   ;;  %v717_v1 = vld [vmem:[%s1034_s1 + $0x8] sm:$0xff] (!%p166_p9)   ;;  %s595_s5 = sshll.u32 (!%p166_p9), %s872_s19, 4  ;;  %v718_v2 = vld [vmem:[%s1034_s1 + $0x10] ss:$0 sps:$4 sm:$0x33] (!%p166_p9)  }
   0xf   : > { %169 = sbr.rel (%p166_p9) target bundleno = 339 (0x153), region = 32  ;;  %637 = vmatprep.subr.bf16.mxu0 (!%p166_p9), %v716_v0  ;;  %p192_p10 = scmp.lt.s32.totalorder (!%p166_p9), %s595_s5, 63  ;;  %659 = vmatprep.subr.bf16.mxu1 (!%p166_p9), %v716_v0  ;;  %vm307_vm0 = vcmask (!%p166_p9), 1041408   ;;  %vm282_vm1 = vcmask (!%p166_p9), 293888   ;;  %v597_v12 = vld [vmem:[%s1035_s2] ss:$0 sm:$0xff] (!%p166_p9) }
  0x10   : > { %638 = vmatpush3.bf16.msra.mxu0 (!%p166_p9), %v716_v0  ;;  %662 = vmatpush3.bf16.msra.mxu1 (!%p166_p9), %v716_v0  ;;  %v309_v3 = vsel (!%p166_p9), %vm307_vm0, %v718_v2, 0  ;;  %s186_s12 = sand.u32 (!%p166_p9), 1, %s811_s16   ;;  %vm482_vm2 = vcmask (!%p166_p9), 1040384   ;;  %p617_p11 = scmp.ne.s32.totalorder (!%p166_p9), %s872_s19, 0 }
  0x11   : > { %639 = vmatprep.subr.bf16.mxu0 (!%p166_p9), %v717_v1  ;;  %660 = vmatprep.subr.bf16.mxu1 (!%p166_p9), %v717_v1  ;;  %s594_s13 = sshll.u32 (!%p166_p9), %s186_s12, 7 }
  0x12   : > { %s930_s22 = scalar_lea.vmem (!%p166_p9), [#allocation2], %s594_s13 }
  0x14   : > { %640 = vmatpush3.bf16.msra.mxu0 (!%p166_p9), %v717_v1  ;;  %663 = vmatpush3.bf16.msra.mxu1 (!%p166_p9), %v717_v1 }
  0x15   : > { %665 = vmatprep.subr.msk.bf16.mxu0 (!%p166_p9), %vm307_vm0, %v718_v2  ;;  %666 = vmatprep.subr.msk.bf16.mxu1 (!%p166_p9), %vm307_vm0, %v718_v2 }
  0x16   : > { %s1045_s5 = smov (!%p192_p10, %s595_s5), 63 }
  0x17   : > { %s596_s8 = sshll.u32 %s1045_s5, 2 }
  0x18   : > { %s195_s11 = scalar_lea.vmem %s1033_s0, %s596_s8  ;;  %642 = vmatpush3.bf16.msra.mxu0 %v309_v3  ;;  %664 = vmatpush3.bf16.msra.mxu1 %v309_v3 }
  0x19   : > { %v719_v4 = vld [vmem:[%s195_s11] sm:$0xff]   ;;  %v720_v5 = vld [vmem:[%s195_s11 + $0x8] sm:$0xff]   ;;  %v721_v6 = vld [vmem:[%s195_s11 + $0x10] sm:$0xff]  }
  0x1a   : > { %643 = vmatprep.mubr.msk.bf16.mxu0 %vm282_vm1, %v719_v4  ;;  %v723_v7 = vld [vmem:[%s195_s11 + $0x20] sm:$0xff]   ;;  %v724_v8 = vld [vmem:[%s195_s11 + $0x28] sm:$0xff]   ;;  %v725_v9 = vld [vmem:[%s195_s11 + $0x30] sm:$0xff]  }
  0x1b   : > { %644 = vmatmul.mubr.msk.bf16.vlgmr.msra.gmra.mrb[0].mxu0 %vm282_vm1, %v720_v5  ;;  %651 = vmatprep.mubr.msk.bf16.mxu1 %vm282_vm1, %v723_v7  ;;  %v722_v10 = vld [vmem:[%s195_s11 + $0x18] sm:$0xff]  }
  0x1c   : > { %647 = vmatprep.mubr.msk.bf16.mxu0 %vm282_vm1, %v721_v6  ;;  %652 = vmatmul.mubr.msk.bf16.vlgmr.msra.gmra.mrb[0].mxu1 %vm282_vm1, %v724_v8  ;;  %v726_v11 = vld [vmem:[%s195_s11 + $0x38] sm:$0xff]  }
  0x1d   : > { %655 = vmatprep.mubr.msk.bf16.mxu1 %vm282_vm1, %v725_v9 }
  0x23   : > { %648 = vmatmul.mubr.msk.bf16.gmra.mrb[4].mxu0 %vm282_vm1, %v722_v10 }
  0x24   : > { %656 = vmatmul.mubr.msk.bf16.gmra.mrb[4].mxu1 %vm282_vm1, %v726_v11 }
  0xee   : > { %v645_v13 = vpop.f32.mrb[0].mxu0 }
  0xef   : > { %v354_v14 = vadd.f32 %v645_v13, %v597_v12  ;;  %v345_v15 = vpop.f32.mrb[1].mxu0  ;;  %v653_v16 = vpop.f32.mrb[0].mxu1 }
  0xf0   : > { %v346_v17 = vadd.f32 %v597_v12, %v345_v15  ;;  %v646_v18 = vpop.f32.mrb[2].mxu0  ;;  %v928_v19 = vadd.f32 %v653_v16, %v597_v12  ;;  %v377_v20 = vpop.f32.mrb[1].mxu1 }
  0xf1   : > { %410 = vst [vmem:[%s930_s22 + $0x10] sm:$0xff] %v354_v14  ;;  %v357_v21 = vadd.f32 %v646_v18, %v597_v12  ;;  %v348_v22 = vpop.f32.mrb[3].mxu0  ;;  %v378_v23 = vadd.f32 %v597_v12, %v377_v20  ;;  %v654_v24 = vpop.f32.mrb[2].mxu1  ;;  %v447_v32 = vmul.f32 %v354_v14, %v354_v14 }
  0xf2   : > { %408 = vst [vmem:[%s930_s22] sm:$0xff] %v346_v17  ;;  %v349_v25 = vadd.f32 %v597_v12, %v348_v22  ;;  %418 = vst [vmem:[%s930_s22 + $0x50] sm:$0xff] %v928_v19  ;;  %v936_v26 = vadd.f32 %v654_v24, %v597_v12  ;;  %v380_v27 = vpop.f32.mrb[3].mxu1  ;;  %v445_v29 = vmul.f32 %v346_v17, %v346_v17 }
  0xf3   : > { %411 = vst [vmem:[%s930_s22 + $0x18] sm:$0xff] %v357_v21  ;;  %416 = vst [vmem:[%s930_s22 + $0x40] sm:$0xff] %v378_v23  ;;  %v381_v28 = vadd.f32 %v597_v12, %v380_v27  ;;  %v448_v36 = vmul.f32 %v357_v21, %v357_v21  ;;  %v453_v2 = vmul.f32 %v378_v23, %v378_v23 }
  0xf4   : > { %409 = vst [vmem:[%s930_s22 + $0x8] sm:$0xff] %v349_v25  ;;  %v424_v30 = vadd.f32 %v349_v25, %v346_v17  ;;  %v446_v31 = vmul.f32 %v349_v25, %v349_v25  ;;  %419 = vst [vmem:[%s930_s22 + $0x58] sm:$0xff] %v936_v26  ;;  %v455_v8 = vmul.f32 %v928_v19, %v928_v19 }
  0xf5   : > { %417 = vst [vmem:[%s930_s22 + $0x48] sm:$0xff] %v381_v28  ;;  %v454_v7 = vmul.f32 %v381_v28, %v381_v28  ;;  %v456_v11 = vmul.f32 %v936_v26, %v936_v26 }
  0xf6   : > { %v425_v33 = vadd.f32 %v424_v30, %v354_v14  ;;  %v461_v34 = vadd.f32 %v446_v31, %v445_v29  ;;  %v649_v35 = vpop.f32.mrb[4].mxu0 }
  0xf7   : > { %v370_v37 = vadd.f32 %v649_v35, %v597_v12  ;;  %v361_v38 = vpop.f32.mrb[5].mxu0  ;;  %v657_v39 = vpop.f32.mrb[4].mxu1 }
  0xf8   : > { %v462_v40 = vadd.f32 %v461_v34, %v447_v32  ;;  %v362_v41 = vadd.f32 %v597_v12, %v361_v38  ;;  %v426_v42 = vadd.f32 %v425_v33, %v357_v21  ;;  %v650_v43 = vpop.f32.mrb[6].mxu0  ;;  %v402_v44 = vadd.f32 %v657_v39, %v597_v12  ;;  %v393_v45 = vpop.f32.mrb[5].mxu1 }
  0xf9   : > { %414 = vst [vmem:[%s930_s22 + $0x30] sm:$0xff] %v370_v37  ;;  %v373_v46 = vadd.f32 %v650_v43, %v597_v12  ;;  %v364_v47 = vpop.f32.mrb[7].mxu0  ;;  %v394_v48 = vadd.f32 %v597_v12, %v393_v45  ;;  %v658_v49 = vpop.f32.mrb[6].mxu1  ;;  %v451_v60 = vmul.f32 %v370_v37, %v370_v37 }
  0xfa   : > { %412 = vst [vmem:[%s930_s22 + $0x20] sm:$0xff] %v362_v41  ;;  %v427_v50 = vadd.f32 %v426_v42, %v362_v41  ;;  %v449_v51 = vmul.f32 %v362_v41, %v362_v41  ;;  %v463_v52 = vadd.f32 %v462_v40, %v448_v36  ;;  %v365_v53 = vadd.f32 %v597_v12, %v364_v47  ;;  %v396_v54 = vpop.f32.mrb[7].mxu1 }
  0xfb   : > { %422 = vst [vmem:[%s930_s22 + $0x70] sm:$0xff] %v402_v44  ;;  %415 = vst [vmem:[%s930_s22 + $0x38] sm:$0xff] %v373_v46  ;;  %v405_v55 = vadd.f32 %v658_v49, %v597_v12  ;;  %v397_v59 = vadd.f32 %v597_v12, %v396_v54  ;;  %v452_v63 = vmul.f32 %v373_v46, %v373_v46  ;;  %v821_v40 = vmov (!%p617_p11), 0.0  }
  0xfc   : > { %420 = vst [vmem:[%s930_s22 + $0x60] sm:$0xff] %v394_v48  ;;  %v464_v56 = vadd.f32 %v463_v52, %v449_v51  ;;  %413 = vst [vmem:[%s930_s22 + $0x28] sm:$0xff] %v365_v53  ;;  %v428_v57 = vadd.f32 %v427_v50, %v365_v53  ;;  %v450_v58 = vmul.f32 %v365_v53, %v365_v53 }
  0xfd   : > { %423 = vst [vmem:[%s930_s22 + $0x78] sm:$0xff] %v405_v55  ;;  %421 = vst [vmem:[%s930_s22 + $0x68] sm:$0xff] %v397_v59  ;;  %v457_v14 = vmul.f32 %v394_v48, %v394_v48  ;;  %v458_v20 = vmul.f32 %v397_v59, %v397_v59  ;;  %v459_v21 = vmul.f32 %v402_v44, %v402_v44 }
  0xfe   : > { %v429_v61 = vadd.f32 %v428_v57, %v370_v37  ;;  %v465_v62 = vadd.f32 %v464_v56, %v450_v58  ;;  %v460_v24 = vmul.f32 %v405_v55, %v405_v55  ;;  %488 = vst [vmem:[#allocation4] sm:$0x3] (!%p617_p11), %v821_v40 }
 0x100   : > { %v466_v0 = vadd.f32 %v465_v62, %v451_v60  ;;  %v430_v1 = vadd.f32 %v429_v61, %v373_v46 }
 0x102   : > { %v431_v3 = vadd.f32 %v430_v1, %v378_v23  ;;  %v467_v4 = vadd.f32 %v466_v0, %v452_v63 }
 0x104   : > { %v468_v5 = vadd.f32 %v467_v4, %v453_v2  ;;  %v432_v6 = vadd.f32 %v431_v3, %v381_v28 }
 0x106   : > { %v433_v9 = vadd.f32 %v432_v6, %v928_v19  ;;  %v469_v10 = vadd.f32 %v468_v5, %v454_v7 }
 0x108   : > { %v470_v12 = vadd.f32 %v469_v10, %v455_v8  ;;  %v434_v13 = vadd.f32 %v433_v9, %v936_v26 }
 0x10a   : > { %v435_v15 = vadd.f32 %v434_v13, %v394_v48  ;;  %v471_v16 = vadd.f32 %v470_v12, %v456_v11 }
 0x10c   : > { %v472_v17 = vadd.f32 %v471_v16, %v457_v14  ;;  %v436_v18 = vadd.f32 %v435_v15, %v397_v59 }
 0x10e   : > { %v437_v22 = vadd.f32 %v436_v18, %v402_v44  ;;  %v473_v23 = vadd.f32 %v472_v17, %v458_v20 }
 0x110   : > { %v438_v25 = vadd.f32 %v437_v22, %v405_v55  ;;  %v474_v27 = vadd.f32 %v473_v23, %v459_v21 }
 0x112   : > { %v439_v19 = vrot.slane %v438_v25, 4  ;;  %v475_v28 = vadd.f32 %v474_v27, %v460_v24 }
 0x114   : > { %v440_v29 = vadd.f32 %v439_v19, %v438_v25  ;;  %v476_v30 = vrot.slane %v475_v28, 4 }
 0x116   : > { %v441_v31 = vrot.slane %v440_v29, 2  ;;  %v477_v32 = vadd.f32 %v476_v30, %v475_v28 }
 0x118   : > { %v442_v33 = vadd.f32 %v441_v31, %v440_v29  ;;  %v478_v26 = vrot.slane %v477_v32, 2 }
 0x11a   : > { %v443_v34 = vrot.slane %v442_v33, 1  ;;  %v479_v35 = vadd.f32 %v478_v26, %v477_v32  ;;  %487 = sbr.rel (%p617_p11) target bundleno = 289 (0x121), region = 36 }
 0x11c   : > { %v480_v36 = vrot.slane %v479_v35, 1  ;;  %v444_v37 = vadd.f32 %v443_v34, %v442_v33 }
 0x11e   : > { %v481_v38 = vadd.f32 %v480_v36, %v479_v35 }
 0x120   : > { %v483_v39 = vsel %vm482_vm2, %v444_v37, %v481_v38 }
 0x121 PF: > { %v489_v41 = vld [vmem:[#allocation4] sm:$0x3]  ;;  %s625_s23 = sshll.u32 %s872_s19, 11  ;;  %s506_s30 = sshll.u32 %s930_s22, 4  ;;  %s966_s30 = int_to_ptr.vmem [resolvable:$true] %s506_s30 }
 0x122   : > { %v490_v42 = vadd.f32 %v489_v41, %v483_v39  ;;  %s963_s29 = scalar_lea.hbm %s1036_s3, %s625_s23  ;;  %s970_s5 = scalar_lea.sflag [#allocation3], %s186_s12 }
 0x123   : > { %s727_s6 = scalar_lea.vmem %s966_s30, 2048  ;;  %s822_s7 = smov [#allocation2]  }
 0x124   : > { %491 = vst [vmem:[#allocation4] sm:$0x3] %v490_v42  ;;  %p728_p12 = scmp.ne.s32.totalorder %s966_s30, %s727_s6  ;;  %s731_s8 = sshll.u32 %s822_s7, 4  ;;  %s732_s8 = int_to_ptr.vmem [resolvable:$false] %s731_s8 }
 0x125   : > { %s733_s9 = scalar_lea.vmem %s732_s8, 4096  ;;  %p734_p1 = scmp.lt.s32.totalorder %s966_s30, %s732_s8 }
 0x126   : > { %p729_p13 = pnand %p728_p12, %p891_p5  ;;  %p735_p3 = scmp.lt.s32.totalorder %s733_s9, %s727_s6 }
 0x128   : > { %p730_p0 = pneg %p729_p13  ;;  %p736_p4 = por %p735_p3, %p734_p1 }
 0x12a   : > { %p737_p7 = pnand %p736_p4, %p730_p0 }
 0x12c   : > { %740 = shalt.err (!%p737_p7)
}
 0x12d   : > { %s741_s10 = scalar_lea.hbm %s963_s29, 2048  ;;  %s745_s13 = scalar_lea.hbm %s1036_s3, 8192 }
 0x12e   : > { %p742_p8 = scmp.ne.s32.totalorder %s963_s29, %s741_s10  ;;  %p746_p11 = scmp.lt.u32.totalorder %s963_s29, %s1036_s3 }
 0x12f   : > { %p747_p12 = scmp.lt.u32.totalorder %s745_s13, %s741_s10  ;;  %p749_p0 = scmp.lt.u32.totalorder %s741_s10, %s963_s29 }
 0x130   : > { %p743_p9 = pnand %p742_p8, %p891_p5 }
 0x131   : > { %p748_p13 = por %p747_p12, %p746_p11 }
 0x132   : > { %p744_p10 = pneg %p743_p9 }
 0x133   : > { %p750_p1 = por %p749_p0, %p748_p13 }
 0x135   : > { %p751_p3 = pnand %p750_p1, %p744_p10 }
 0x137   : > { %754 = shalt.err (!%p751_p3)
}
 0x138   : > { %s823_s22 = smov 128   ;;  %s824_s23 = smov 8  }
 0x139   : > { %667 = dma.vmem_to_hbm [thread:$0]  (%p891_p5), %s966_s30, 2048, %s963_s29, %s970_s5, %s823_s22, %s823_s22, %s824_s23  }
 0x13a   : > { %s825_s27 = smov [#allocation4]  }
 0x13b   : > { %s520_s28 = sshll.u32 %s825_s27, 4  ;;  %s521_s28 = int_to_ptr.vmem [resolvable:$true] %s520_s28 }
 0x13c   : > { %s755_s6 = scalar_lea.vmem %s521_s28, 32  ;;  %p762_p9 = scmp.lt.s32.totalorder %s521_s28, %s521_s28 }
 0x13d   : > { %p756_p4 = scmp.ne.s32.totalorder %s521_s28, %s755_s6  ;;  %p763_p10 = scmp.lt.s32.totalorder %s755_s6, %s755_s6 }
 0x13f   : > { %p757_p7 = pnand %p756_p4, %p105_p2  ;;  %p764_p11 = por %p763_p10, %p762_p9 }
 0x141   : > { %p758_p8 = pneg %p757_p7 }
 0x143   : > { %p765_p12 = pnand %p764_p11, %p758_p8 }
 0x145   : > { %768 = shalt.err (!%p765_p12)
}
 0x146   : > { %s769_s9 = scalar_lea.hbm %s1037_s4, 32 }
 0x147   : > { %p770_p5 = scmp.ne.s32.totalorder %s1037_s4, %s769_s9  ;;  %p775_p1 = scmp.lt.u32.totalorder %s769_s9, %s1037_s4 }
 0x149   : > { %p771_p13 = pnand %p770_p5, %p105_p2 }
 0x14b   : > { %p772_p0 = pneg %p771_p13 }
 0x14d   : > { %p777_p3 = pnand %p775_p1, %p772_p0 }
 0x14f   : > { %780 = shalt.err (!%p777_p3)
}
 0x150   : > { %669 = dma.vmem_to_hbm [thread:$0]  (%p105_p2), %s521_s28, 32, %s1037_s4, [#allocation5]  }
 0x151   : > { %798 = dma.done.wait (%p105_p2), [#allocation5], 32  }
 0x152   : > { %800 = vsyncadd (%p105_p2), [#allocation5], 4294967264 }
 0x153 PF: > { %p679_p4 = scmp.ge.s32.totalorder %s819_s18, 2  ;;  %s536_s12 = sand.u32 1, %s807_s15  }
 0x154   : > { %s537_s13 = scalar_lea.sflag [#allocation3], %s536_s12 }
 0x155   : > { %p674_p7 = pnand %p679_p4, %p895_p6 }
 0x157   : > { %802 = dma.done.wait (!%p674_p7), %s537_s13, 2048  }
 0x158   : > { %804 = vsyncadd (!%p674_p7), %s537_s13, 4294965248  ;;  %p16_p8 = scmp.ge.s32.totalorder %s876_s21, 6   ;;  %s1040_s15 = smov %s811_s16 }
 0x159   : > { %s1041_s16 = smov %s815_s17  ;;  %s1042_s17 = smov %s887_s24 }
 0x15a   : > { %s1043_s18 = smov %s876_s21  ;;  %18 = sbr.rel (!%p16_p8) target bundleno = 4 (0x4), region = 79 }
 0x161   :  { %542 = vsyncpa [#allocation3], 1 }
 0x162   :  { %544 = vsyncpa [#allocation3 + $0x1], 1 }
 0x163   :  { %545 = vsyncpa [#allocation5], 1 }

</bundles_post_ra>
